<compile_context>
chip_gen: v6e
topology: v6e:2x2x1
jax: 0.10.0
libtpu: 0.0.40
codegen_flags: <defaults>
</compile_context>

<pallas_src>
import jax
import jax.numpy as jnp
from jax.experimental import pallas as pl
from jax.experimental.pallas import tpu as pltpu

_MIB = 1 << 20


# ----------------------------- kernels ---------------------------------------


def _linear_relu_kernel(x_ref, w_ref, o_ref):
    """Single-shot tile: out = relu(x_tile @ w_tile), f32 accumulation on the MXU."""
    acc = jnp.dot(x_ref[...], w_ref[...], preferred_element_type=jnp.float32)
    o_ref[...] = jnp.maximum(acc, 0.0).astype(o_ref.dtype)


def _linear_relu_acc_kernel(x_ref, w_ref, o_ref, acc_ref):
    """One (tm, tn) output tile; grid axis 2 loops over the K (reduction) axis."""
    k = pl.program_id(2)

    @pl.when(k == 0)
    def _():
        acc_ref[...] = jnp.zeros_like(acc_ref)

    acc_ref[...] += jnp.dot(x_ref[...], w_ref[...],
                            preferred_element_type=jnp.float32)

    @pl.when(k == pl.num_programs(2) - 1)
    def _():
        o_ref[...] = jnp.maximum(acc_ref[...], 0.0).astype(o_ref.dtype)


# ----------------------------- helpers ----------------------------------------


def _vmem_budget_bytes():
    """~75% of this generation's physical VMEM (~48 MiB v7x, ~96 MiB v5e/v6e)."""
    cap = None
    try:
        info = pltpu.get_tpu_info()
        for attr in ("vmem_capacity_bytes", "vmem_size_bytes", "vmem_bytes"):
            v = getattr(info, attr, None)
            if v:
                cap = int(v)
                break
    except Exception:
        cap = None
    if not cap:
        cap = 64 * _MIB  # conservative fallback = smallest generation (v7x)
    return (cap * 3) // 4


def _sublane_gran(dtype):
    """Min sublane granularity for a dtype: 8 (4B), 16 (2B), 32 (1B)."""
    return max(8, 32 // jnp.dtype(dtype).itemsize)


def _pick_tile(dim, target, granularity):
    """Largest multiple of `granularity` <= target that divides `dim`; else full."""
    if dim <= target:
        return dim
    t = (target // granularity) * granularity
    while t >= granularity:
        if dim % t == 0:
            return t
        t -= granularity
    return dim  # full extent is always a legal block shape


def _validate_tile(name, t, dim, granularity):
    if t == dim:
        return
    if dim % t != 0 or t % granularity != 0:
        raise ValueError(
            f"{name}={t} must equal the full dim ({dim}) or both divide it and be "
            f"a multiple of {granularity}")


def _single_buffered_spec(block_shape, index_map):
    """Weight BlockSpec requesting a single VMEM buffer. Returns (spec, n_buffers)."""
    try:
        return pl.BlockSpec(block_shape, index_map,
                            pipeline_mode=pl.Buffered(1)), 1
    except TypeError:  # older jax without pipeline_mode support
        return pl.BlockSpec(block_shape, index_map), 2


# ----------------------------- wrapper -----------------------------------------


def linear_with_sleep_forward(x, weight, sleep_ms: int = 0, *,
                              tm=None, tn=None, tk=None, mxu_dtype=None):
    """relu(x @ weight) as a Pallas TPU kernel.

    x:      [M, K]
    weight: [K, N]   (the module uses K == N == dim)
    mxu_dtype: optional narrower dtype (e.g. jnp.bfloat16) for the MXU operands;
               cast happens at the pallas_call boundary so HBM traffic is halved
               too; accumulation stays f32 and output keeps the input dtype.
    """
    # TODO(synk): torch.<device>._sleep (a busy-wait only used to create overlap in
    # the FSDP test) has no numerical effect and no clean Pallas equivalent
    # (pl.delay is an anti-pattern); it is intentionally omitted.
    del sleep_ms

    M, K = x.shape
    K2, N = weight.shape
    assert K == K2, f"inner dims must match, got {K} vs {K2}"

    out_dtype = x.dtype
    if mxu_dtype is not None and jnp.dtype(mxu_dtype) != jnp.dtype(x.dtype):
        # Boundary cast: the HBM->VMEM DMAs now move the narrow bytes.
        x = x.astype(mxu_dtype)
        weight = weight.astype(mxu_dtype)

    in_itemsize = jnp.dtype(x.dtype).itemsize
    out_itemsize = jnp.dtype(out_dtype).itemsize
    tm_gran = max(_sublane_gran(x.dtype), _sublane_gran(out_dtype))

    vmem_cap = _vmem_budget_bytes()
    cost = pl.CostEstimate(
        flops=2 * M * N * K,
        transcendentals=0,
        bytes_accessed=(M * K + K * N) * in_itemsize + M * N * out_itemsize)

    user_tiled = any(t is not None for t in (tm, tn, tk))

    if not user_tiled:
        # --- Path A: weight-resident row-strip kernel -------------------------
        tm_res = _pick_tile(M, 512, tm_gran)
        nj = 2 if (N % 256 == 0) else 1          # N split -> both v7x TCs get work
        n_blk = N // nj
        w_map = lambda j, i: (0, j)

        w_bytes = K * n_blk * in_itemsize
        strip_bytes = 2 * tm_res * K * in_itemsize + 2 * tm_res * n_blk * out_itemsize

        w_spec = None
        resident_bytes = None
        if 2 * w_bytes + strip_bytes <= vmem_cap:
            # Plenty of room: default (double-buffered) spec; index is constant over i
            # so the weight is only DMA'd nj times total anyway.
            w_spec = pl.BlockSpec((K, n_blk), w_map)
            resident_bytes = 2 * w_bytes + strip_bytes
        elif w_bytes + strip_bytes <= vmem_cap:
            # Weight only fits single-buffered: explicitly request one buffer.
            w_spec, n_bufs = _single_buffered_spec((K, n_blk), w_map)
            resident_bytes = n_bufs * w_bytes + strip_bytes

        if w_spec is not None and resident_bytes <= vmem_cap:
            vmem_limit = int(min(vmem_cap, max(resident_bytes * 5 // 4, 32 * _MIB)))
            return pl.pallas_call(
                _linear_relu_kernel,
                out_shape=jax.ShapeDtypeStruct((M, N), out_dtype),
                grid_spec=pltpu.PrefetchScalarGridSpec(
                    num_scalar_prefetch=0,
                    # j (N-split) outer, i (M-strip) inner: the weight block index is
                    # constant across the whole inner sweep (no re-DMA).
                    grid=(nj, M // tm_res),
                    in_specs=[
                        pl.BlockSpec((tm_res, K), lambda j, i: (i, 0)),
                        w_spec,
                    ],
                    out_specs=pl.BlockSpec((tm_res, n_blk), lambda j, i: (i, j)),
                ),
                compiler_params=pltpu.CompilerParams(
                    dimension_semantics=("parallel", "parallel"),
                    vmem_limit_bytes=vmem_limit,
                ),
                cost_estimate=cost,
            )(x, weight)

    # --- Path B: tiled grid ----------------------------------------------------
    tm = tm or _pick_tile(M, 512, tm_gran)
    tn = tn or _pick_tile(N, 1024, 128)
    tk = tk or _pick_tile(K, 1024, 128)
    _validate_tile("tm", tm, M, tm_gran)  # sublane dim of x / out blocks
    _validate_tile("tn", tn, N, 128)      # lane dim of weight / out blocks
    _validate_tile("tk", tk, K, 128)      # lane dim of x, sublane dim of weight

    if tk == K:
        # 2-D (i, j) grid: no reduction axis, no accumulator scratch, one fused
        # ReLU store. j innermost -> the x strip block (i, 0) is constant across
        # the j sweep so Pallas skips its re-DMA.
        needed = 2 * (tm * K + K * tn) * in_itemsize + 2 * tm * tn * out_itemsize
        vmem_limit = int(min(vmem_cap, max(needed * 5 // 4, 32 * _MIB)))
        return pl.pallas_call(
            _linear_relu_kernel,
            out_shape=jax.ShapeDtypeStruct((M, N), out_dtype),
            grid_spec=pltpu.PrefetchScalarGridSpec(
                num_scalar_prefetch=0,
                grid=(M // tm, N // tn),
                in_specs=[
                    pl.BlockSpec((tm, K), lambda i, j: (i, 0)),
                    pl.BlockSpec((K, tn), lambda i, j: (0, j)),
                ],
                out_specs=pl.BlockSpec((tm, tn), lambda i, j: (i, j)),
            ),
            compiler_params=pltpu.CompilerParams(
                dimension_semantics=("parallel", "parallel"),
                vmem_limit_bytes=vmem_limit,
            ),
            cost_estimate=cost,
        )(x, weight)

    # 3-D (i, j, k) grid with an f32 VMEM accumulator; reduction axis last.
    needed = (2 * (tm * tk + tk * tn) * in_itemsize
              + 2 * tm * tn * out_itemsize + tm * tn * 4)
    vmem_limit = int(min(vmem_cap, max(needed * 5 // 4, 32 * _MIB)))
    return pl.pallas_call(
        _linear_relu_acc_kernel,
        out_shape=jax.ShapeDtypeStruct((M, N), out_dtype),
        grid_spec=pltpu.PrefetchScalarGridSpec(
            num_scalar_prefetch=0,
            grid=(M // tm, N // tn, K // tk),
            in_specs=[
                pl.BlockSpec((tm, tk), lambda i, j, k: (i, k)),
                pl.BlockSpec((tk, tn), lambda i, j, k: (k, j)),
            ],
            out_specs=pl.BlockSpec((tm, tn), lambda i, j, k: (i, j)),
            scratch_shapes=[pltpu.VMEM((tm, tn), jnp.float32)],
        ),
        compiler_params=pltpu.CompilerParams(
            dimension_semantics=("parallel", "parallel", "arbitrary"),
            vmem_limit_bytes=vmem_limit,
        ),
        cost_estimate=cost,
    )(x, weight)


if __name__ == "__main__":
    key = jax.random.PRNGKey(0)
    kx, kw, kx2, kw2, kx3, kw3 = jax.random.split(key, 6)

    # 1) Small shapes consistent with the module: LinearWithSleep(dim), x: [batch, dim].
    batch, dim = 8, 32
    x = jax.random.normal(kx, (batch, dim), dtype=jnp.float32)
    weight = jax.random.normal(kw, (dim, dim), dtype=jnp.float32)  # torch.randn((dim, dim))
    out = jax.block_until_ready(linear_with_sleep_forward(x, weight, sleep_ms=0))
    ref = jnp.maximum(x @ weight, 0.0)
    assert out.shape == (batch, dim)
    assert jnp.allclose(out, ref, atol=1e-4, rtol=1e-5), "weight-resident path mismatch"

    # 2) Tiled 3-D (i, j, k) accumulator path with explicit tiles.
    M2, D2 = 256, 1024
    x2 = jax.random.normal(kx2, (M2, D2), dtype=jnp.float32)
    w2 = jax.random.normal(kw2, (D2, D2), dtype=jnp.float32)
    out2 = jax.block_until_ready(
        linear_with_sleep_forward(x2, w2, sleep_ms=0, tm=256, tn=512, tk=512))
    ref2 = jnp.maximum(
        jnp.dot(x2, w2, preferred_element_type=jnp.float32, precision="highest"), 0.0)
    assert jnp.allclose(out2, ref2, atol=1e-1, rtol=1e-2), "3-D tiled path mismatch"

    # 3) Weight-resident path (N split over two parallel blocks) with bf16 operands
    #    fed to the MXU/DMA and f32 accumulation; output stays f32.
    out3 = jax.block_until_ready(
        linear_with_sleep_forward(x2, w2, sleep_ms=0, mxu_dtype=jnp.bfloat16))
    assert out3.dtype == jnp.float32
    assert jnp.allclose(out3, ref2, atol=1.5, rtol=5e-2), "bf16-feed path mismatch"

    # 4) Collapsed-K (2-D grid, no accumulator) path via user tm/tn with tk == K.
    M3, D3 = 128, 256
    x3 = jax.random.normal(kx3, (M3, D3), dtype=jnp.float32)
    w3 = jax.random.normal(kw3, (D3, D3), dtype=jnp.float32)
    out4 = jax.block_until_ready(
        linear_with_sleep_forward(x3, w3, sleep_ms=0, tm=64, tn=128))
    ref4 = jnp.maximum(
        jnp.dot(x3, w3, preferred_element_type=jnp.float32, precision="highest"), 0.0)
    assert jnp.allclose(out4, ref4, atol=1e-3, rtol=1e-4), "2-D collapsed-K path mismatch"

    print("KERNEL_OK")
</pallas_src>

<mosaic_0001>
module attributes {stable_mosaic.version = 11 : i64} {
  func.func @_linear_relu_kernel(%arg0: i32, %arg1: i32, %arg2: memref<8x32xf32, #tpu.memory_space<vmem>>, %arg3: memref<32x32xf32, #tpu.memory_space<vmem>>, %arg4: memref<8x32xf32, #tpu.memory_space<vmem>>) attributes {dimension_semantics = [#tpu.dimension_semantics<parallel>, #tpu.dimension_semantics<parallel>], iteration_bounds = array<i64: 1, 1>, scalar_prefetch = 0 : i64, scratch_operands = 0 : i64, tpu.core_type = #tpu.core_type<tc>, window_params = [{transform_indices = @transform_0, window_bounds = array<i64: 8, 32>}, {transform_indices = @transform_1, window_bounds = array<i64: 32, 32>}, {transform_indices = @transform_2, window_bounds = array<i64: 8, 32>}]} {
    %c0 = arith.constant 0 : index
    %c0_0 = arith.constant 0 : index
    %0 = vector.load %arg2[%c0, %c0_0] : memref<8x32xf32, #tpu.memory_space<vmem>>, vector<8x32xf32>
    %c0_1 = arith.constant 0 : index
    %c0_2 = arith.constant 0 : index
    %1 = vector.load %arg3[%c0_1, %c0_2] : memref<32x32xf32, #tpu.memory_space<vmem>>, vector<32x32xf32>
    %cst = arith.constant dense<0.000000e+00> : vector<8x32xf32>
    %2 = tpu.matmul %0, %1, %cst {dimension_numbers = #tpu.dot_dimension_numbers<[1], [0], [0], [1], [0, 0, 1, 1], [], []>} : vector<8x32xf32>, vector<32x32xf32>, vector<8x32xf32> -> vector<8x32xf32>
    %cst_3 = arith.constant 0.000000e+00 : f32
    %3 = vector.broadcast %cst_3 : f32 to vector<8x32xf32>
    %4 = arith.maximumf %2, %3 : vector<8x32xf32>
    %c0_4 = arith.constant 0 : index
    %c0_5 = arith.constant 0 : index
    %5 = vector.load %arg4[%c0_4, %c0_5] : memref<8x32xf32, #tpu.memory_space<vmem>>, vector<8x32xf32>
    tpu.vector_store %arg4[%c0_4, %c0_5], %4 {strides = array<i32>} : memref<8x32xf32, #tpu.memory_space<vmem>>, vector<8x32xf32>,
    return
  }
  func.func @transform_0(%arg0: i32, %arg1: i32) -> (i32, i32) {
    %c0_i32 = arith.constant 0 : i32
    %c0_i32_0 = arith.constant 0 : i32
    return %arg1, %c0_i32 : i32, i32
  }
  func.func @transform_1(%arg0: i32, %arg1: i32) -> (i32, i32) {
    %c0_i32 = arith.constant 0 : i32
    %c0_i32_0 = arith.constant 0 : i32
    return %c0_i32, %arg0 : i32, i32
  }
  func.func @transform_2(%arg0: i32, %arg1: i32) -> (i32, i32) {
    %c0_i32 = arith.constant 0 : i32
    return %arg1, %arg0 : i32, i32
  }
}

</mosaic_0001>

<bundles_post_ra>
// kernel: tpu_custom_call.1
= control target key start
LH: loop header
LB: loop body
LE: loop exit
PB: predicated region body
PF: predicated region fallthrough
CT: control target
= control target key end

     0   :  { %7 = vsyncpa [#allocation3], 0  ;;  %s256_s0 = inlined_call_operand.hbm [shape: f32[8,32], index: 0, kind: input, shape index: {}]   ;;  %s257_s1 = inlined_call_operand.hbm [shape: f32[32,32], index: 1, kind: input, shape index: {}]   ;;  %s258_s2 = inlined_call_operand.hbm [shape: f32[8,32], index: 2, kind: output, shape index: {}]  }
   0x1   :  { %8 = vsyncpa [#allocation6], 0 }
   0x2   :  { %9 = vsyncpa [#allocation4], 0  ;;  %s225_s9 = smov [#allocation2]   ;;  %s226_s11 = smov [#allocation5]  }
   0x3   :  { %s16_s10 = sshll.u32 %s225_s9, 4  ;;  %s25_s12 = sshll.u32 %s226_s11, 4  ;;  %s17_s10 = int_to_ptr.vmem [resolvable:$true] %s16_s10  ;;  %s26_s12 = int_to_ptr.vmem [resolvable:$true] %s25_s12 }
   0x4   :  { %s167_s13 = scalar_lea.vmem %s17_s10, 128  ;;  %p172_p1 = scmp.lt.s32.totalorder %s17_s10, %s17_s10 }
   0x5   :  { %p168_p0 = scmp.ne.s32.totalorder %s17_s10, %s167_s13  ;;  %p173_p2 = scmp.lt.s32.totalorder %s167_s13, %s167_s13 }
   0x7   :  { %p174_p3 = por %p173_p2, %p172_p1 }
   0x9   :  { %p175_p4 = pnand %p174_p3, %p168_p0 }
   0xb   :  { %178 = shalt.err (!%p175_p4)
}
   0xc   :  { %19 = dma.hbm_to_vmem [thread:$0]  %s256_s0, 128, %s17_s10, [#allocation3]  }
   0xd   :  { %s187_s16 = scalar_lea.vmem %s26_s12, 512  ;;  %p192_p6 = scmp.lt.s32.totalorder %s26_s12, %s26_s12 }
   0xe   :  { %p188_p5 = scmp.ne.s32.totalorder %s26_s12, %s187_s16  ;;  %p193_p7 = scmp.lt.s32.totalorder %s187_s16, %s187_s16 }
  0x10   :  { %p194_p8 = por %p193_p7, %p192_p6 }
  0x12   :  { %p195_p9 = pnand %p194_p8, %p188_p5 }
  0x14   :  { %198 = shalt.err (!%p195_p9)
}
  0x15   :  { %s227_s17 = smov 128   ;;  %s228_s18 = smov 8  }
  0x16   :  { %31 = dma.hbm_to_vmem [thread:$0]  %s257_s1, 512, %s26_s12, [#allocation6], %s227_s17, %s227_s17, %s228_s18  }
  0x17   :  { %219 = dma.done.wait [#allocation3], 128  }
  0x18   :  { %220 = vsyncadd [#allocation3], 4294967168 }
  0x19   :  { %221 = dma.done.wait [#allocation6], 512  }
  0x1a   :  { %222 = vsyncadd [#allocation6], 4294966784  ;;  %v229_v0 = vmov 0.0   ;;  %vm230_vm0 = vmmov 0   ;;  %v42_v1 = vld [vmem:[#allocation5 + $0x18] sm:$0xff]  ;;  %v41_v2 = vld [vmem:[#allocation5 + $0x10] sm:$0xff] }
  0x1b   :  { %141 = vmatprep.subr.mxu0 %v229_v0  ;;  %149 = vmatprep.mubr.msk.f32.mxu0 %vm230_vm0, %v229_v0  ;;  %v40_v3 = vld [vmem:[#allocation5 + $0x8] sm:$0xff]  ;;  %v39_v4 = vld [vmem:[#allocation5] sm:$0xff]  ;;  %v38_v5 = vld [vmem:[#allocation2] sm:$0xff]  ;;  %vm43_vm1 = vcmask 261120   ;;  %s231_s0 = smov [#allocation7]  }
  0x1c   :  { %142 = vmatpush3.msra.mxu0 %v42_v1  ;;  %s125_s1 = sshll.u32 %s231_s0, 4  ;;  %s126_s1 = int_to_ptr.vmem [resolvable:$true] %s125_s1 }
  0x1d   :  { %143 = vmatprep.subr.mxu0 %v229_v0  ;;  %s199_s21 = scalar_lea.vmem %s126_s1, 128  ;;  %p204_p11 = scmp.lt.s32.totalorder %s126_s1, %s126_s1 }
  0x1e   :  { %144 = vmatpush3.msra.mxu0 %v41_v2  ;;  %p200_p10 = scmp.ne.s32.totalorder %s126_s1, %s199_s21  ;;  %p205_p12 = scmp.lt.s32.totalorder %s199_s21, %s199_s21 }
  0x1f   :  { %145 = vmatprep.subr.mxu0 %v229_v0 }
  0x20   :  { %146 = vmatpush3.msra.mxu0 %v40_v3  ;;  %p206_p13 = por %p205_p12, %p204_p11 }
  0x21   :  { %147 = vmatprep.subr.mxu0 %v229_v0 }
  0x22   :  { %148 = vmatpush3.msra.mxu0 %v39_v4  ;;  %p207_p0 = pnand %p206_p13, %p200_p10 }
  0x23   :  { %150 = vmatmul.mubr.msk.f32.vlgmr.msra.gmra.mxu0 %vm43_vm1, %v38_v5 }
  0xe3   :  { %v113_v6 = vpop.f32.mrf.mxu0 }
  0xe4   :  { %v117_v7 = vmax.f32 %v113_v6, 0.0 }
  0xe5   :  { %v151_v8 = vpop.f32.mrf.mxu0 }
  0xe6   :  { %118 = vst.msk [vmem:[#allocation7] sm:$0xff] %vm43_vm1, %v117_v7 }
  0xe7   :  { %210 = shalt.err (!%p207_p0)
}
  0xe8   :  { %128 = dma.vmem_to_hbm [thread:$0]  %s126_s1, 128, %s258_s2, [#allocation4]  }
  0xe9   :  { %223 = dma.done.wait [#allocation4], 128  }
  0xea   :  { %224 = vsyncadd [#allocation4], 4294967168 }
  0xeb   :  { %132 = vsyncpa [#allocation3], 1 }
  0xec   :  { %133 = vsyncpa [#allocation6], 1 }
  0xed   :  { %134 = vsyncpa [#allocation4], 1 }

</bundles_post_ra>
